<compile_context>
chip_gen: v5e
topology: v5e:2x2
jax: 0.10.0
libtpu: 0.0.40
codegen_flags: <defaults>
</compile_context>

<pallas_src>
import functools

import jax
import jax.numpy as jnp
from jax.experimental import pallas as pl
from jax.experimental.pallas import tpu as pltpu


# ----------------------------------------------------------------------------- PRNG
# Threefry-2x32 (ARX only: add / xor / rotate) — portable across Mosaic and the
# CPU interpret harness.  13 rounds is the crush-resistant variant.
_THREEFRY_ROT = (13, 15, 26, 6, 17, 29, 16, 24)


def _rotl32(x, r):
    r = jnp.uint32(r)
    return (x << r) | (x >> (jnp.uint32(32) - r))


def _threefry2x32(key0, key1, x0, x1, rounds=13):
    ks = (key0, key1, key0 ^ key1 ^ jnp.uint32(0x1BD11BDA))
    x0 = x0 + ks[0]
    x1 = x1 + ks[1]
    for r in range(rounds):
        x0 = x0 + x1
        x1 = _rotl32(x1, _THREEFRY_ROT[r % 8])
        x1 = x1 ^ x0
        if (r + 1) % 4 == 0:
            d = (r + 1) // 4
            x0 = x0 + ks[d % 3]
            x1 = x1 + ks[(d + 1) % 3] + jnp.uint32(d)
    return x0, x1


# ----------------------------------------------------------------------------- kernel
def _mask_gen_kernel(seed_ref, t_ref, x_ref, w1_ref, b1_ref, g_ref, beta_ref,
                     w2_ref, b2_ref, mask_ref, *, tile_b):
    # ---- Linear 1 (bf16 MXU operands, f32 accumulate) + LeakyReLU(0.01) ----
    h = jnp.dot(x_ref[...], w1_ref[...], preferred_element_type=jnp.float32)
    h = h + b1_ref[...]
    h = jnp.where(h >= 0.0, h, 0.01 * h)

    # ---- LayerNorm (biased variance over last dim, eps = 1e-5, affine) ----
    mu = jnp.mean(h, axis=-1, keepdims=True)
    var = jnp.mean(jnp.square(h - mu), axis=-1, keepdims=True)
    h = (h - mu) * jax.lax.rsqrt(var + 1e-5)
    h = h * g_ref[...] + beta_ref[...]

    # ---- Linear 2 (out layer) ----
    logits = jnp.dot(h.astype(jnp.bfloat16), w2_ref[...],
                     preferred_element_type=jnp.float32) + b2_ref[...]

    # ---- sigmoid(logits / T), T read from SMEM (no recompile per temperature) ----
    inv_t = 1.0 / t_ref[0]
    p = jax.nn.sigmoid(logits * inv_t)

    # ---- Bernoulli sampling: counter = (global row, col), key = (seed, const) ----
    shape = p.shape
    row = jax.lax.broadcasted_iota(jnp.int32, shape, 0).astype(jnp.uint32)
    col = jax.lax.broadcasted_iota(jnp.int32, shape, 1).astype(jnp.uint32)
    tile_start = (pl.program_id(0) * tile_b).astype(jnp.uint32)
    c0 = tile_start + row                      # distinct stream per batch row / tile
    c1 = col
    k0 = seed_ref[0].astype(jnp.uint32)
    k1 = jnp.uint32(0x3C6EF372)
    bits, _ = _threefry2x32(k0, k1, c0, c1)
    # top 24 bits -> uniform in [0, 1)
    u = (bits >> jnp.uint32(8)).astype(jnp.float32) * jnp.float32(1.0 / (1 << 24))

    mask_ref[...] = (u < p).astype(mask_ref.dtype)


# ----------------------------------------------------------------------------- wrapper
def _round_up(v, m):
    return (v + m - 1) // m * m


def mlp_mask_generator_forward(x, params, seed, T=1.0, out_dtype=jnp.float32):
    """MLPMaskGenerator.forward: MLP -> sigmoid(./T) -> bernoulli, in one pallas_call.

    x:       [B, in_dim] float (any float dtype; matmul runs in bf16)
    params:  dict with w1 [in_dim, hidden], b1 [1, hidden], gamma/beta [1, hidden],
             w2 [hidden, out_dim], b2 [1, out_dim]   (weights pre-transposed vs torch)
    seed:    int / [1] int32 — Bernoulli RNG seed
    T:       temperature (scalar; passed via SMEM, no recompile per value)
    returns: [B, out_dim] mask of 0/1 in `out_dtype` (use jnp.int8 to cut writeback 4x)
    """
    x = jnp.asarray(x)
    B, in_dim = x.shape
    hidden = params["w1"].shape[1]
    out_dim = params["w2"].shape[1]

    # Batch tiling: 512 rows (multiple of 256 for the v6e/v7x MXU) at scale; a tile of
    # 512 x 16 bf16 is ~16 KiB, far under the v5e 16 MiB / v7x 32 MiB scoped defaults.
    if B >= 512:
        tile_b = 512
    else:
        tile_b = max(8, _round_up(B, 8))
    b_pad = _round_up(B, tile_b)
    if b_pad != B:
        x = jnp.pad(x, ((0, b_pad - B), (0, 0)))

    # bf16 operands for the MXU; f32 for bias / LN / sampling math.
    x_bf = x.astype(jnp.bfloat16)
    w1 = params["w1"].astype(jnp.bfloat16)
    w2 = params["w2"].astype(jnp.bfloat16)
    b1 = params["b1"].astype(jnp.float32)
    gamma = params["gamma"].astype(jnp.float32)
    beta = params["beta"].astype(jnp.float32)
    b2 = params["b2"].astype(jnp.float32)

    seed_arr = jnp.asarray(seed, jnp.int32).reshape((1,))
    t_arr = jnp.asarray(T, jnp.float32).reshape((1,))

    grid = (b_pad // tile_b,)
    kernel = functools.partial(_mask_gen_kernel, tile_b=tile_b)

    out_itemsize = jnp.dtype(out_dtype).itemsize
    cost = pl.CostEstimate(
        flops=2 * b_pad * (in_dim * hidden + hidden * out_dim),
        transcendentals=b_pad * (out_dim + 1),          # sigmoid + rsqrt
        bytes_accessed=(x_bf.size * 2 + w1.size * 2 + w2.size * 2
                        + (b1.size + gamma.size + beta.size + b2.size) * 4
                        + b_pad * out_dim * out_itemsize),
    )

    grid_spec = pltpu.PrefetchScalarGridSpec(
        num_scalar_prefetch=1,                              # seed -> SMEM
        grid=grid,
        in_specs=[
            # temperature, one f32 scalar in SMEM
            pl.BlockSpec((1,), lambda i, s: (0,),
                         memory_space=pltpu.MemorySpace.SMEM),
            # x: tiled over batch (double-buffered DMA)
            pl.BlockSpec((tile_b, in_dim), lambda i, s: (i, 0)),
            # weights / biases: resident across the whole grid
            pl.BlockSpec((in_dim, hidden), lambda i, s: (0, 0)),
            pl.BlockSpec((1, hidden), lambda i, s: (0, 0)),
            pl.BlockSpec((1, hidden), lambda i, s: (0, 0)),
            pl.BlockSpec((1, hidden), lambda i, s: (0, 0)),
            pl.BlockSpec((hidden, out_dim), lambda i, s: (0, 0)),
            pl.BlockSpec((1, out_dim), lambda i, s: (0, 0)),
        ],
        out_specs=pl.BlockSpec((tile_b, out_dim), lambda i, s: (i, 0)),
    )

    mask = pl.pallas_call(
        kernel,
        out_shape=jax.ShapeDtypeStruct((b_pad, out_dim), out_dtype),
        grid_spec=grid_spec,
        compiler_params=pltpu.CompilerParams(
            dimension_semantics=("parallel",)),             # shard grid over v7x's 2 TCs
        cost_estimate=cost,
    )(seed_arr, t_arr, x_bf, w1, b1, gamma, beta, w2, b2)

    return mask[:B]


def init_params(key, in_dim, out_dim, hidden):
    """Deterministic synthetic parameter init (PyTorch-Linear-like uniform)."""
    k1, k2, k3, k4 = jax.random.split(key, 4)
    lim1 = 1.0 / jnp.sqrt(in_dim)
    lim2 = 1.0 / jnp.sqrt(hidden)
    return {
        # stored transposed relative to torch: [in_features, out_features]
        "w1": jax.random.uniform(k1, (in_dim, hidden), jnp.float32, -lim1, lim1),
        "b1": jax.random.uniform(k2, (1, hidden), jnp.float32, -lim1, lim1),
        "gamma": jnp.ones((1, hidden), jnp.float32),
        "beta": jnp.zeros((1, hidden), jnp.float32),
        "w2": jax.random.uniform(k3, (hidden, out_dim), jnp.float32, -lim2, lim2),
        "b2": jax.random.uniform(k4, (1, out_dim), jnp.float32, -lim2, lim2),
    }


if __name__ == "__main__":
    key = jax.random.PRNGKey(0)
    k_x, k_p = jax.random.split(key)

    B, IN_DIM, HIDDEN, OUT_DIM = 8, 16, 32, 16
    x = jax.random.normal(k_x, (B, IN_DIM), jnp.float32)
    params = init_params(k_p, IN_DIM, OUT_DIM, HIDDEN)

    mask = mlp_mask_generator_forward(x, params, seed=1234, T=1.0)
    jax.block_until_ready(mask)

    # Sanity: output is binary with the right shape.
    assert mask.shape == (B, OUT_DIM)
    assert bool(jnp.all((mask == 0.0) | (mask == 1.0)))

    print("KERNEL_OK")
</pallas_src>

<mosaic_0001>
module attributes {stable_mosaic.version = 11 : i64} {
  func.func @_mask_gen_kernel(%arg0: i32, %arg1: memref<1xi32, #tpu.memory_space<smem>>, %arg2: memref<1xf32, #tpu.memory_space<smem>>, %arg3: memref<8x16xbf16, #tpu.memory_space<vmem>>, %arg4: memref<16x32xbf16, #tpu.memory_space<vmem>>, %arg5: memref<1x32xf32, #tpu.memory_space<vmem>>, %arg6: memref<1x32xf32, #tpu.memory_space<vmem>>, %arg7: memref<1x32xf32, #tpu.memory_space<vmem>>, %arg8: memref<32x16xbf16, #tpu.memory_space<vmem>>, %arg9: memref<1x16xf32, #tpu.memory_space<vmem>>, %arg10: memref<8x16xf32, #tpu.memory_space<vmem>>) attributes {dimension_semantics = [#tpu.dimension_semantics<parallel>], iteration_bounds = array<i64: 1>, scalar_prefetch = 1 : i64, scratch_operands = 0 : i64, tpu.core_type = #tpu.core_type<tc>, window_params = [{transform_indices = @transform_0, window_bounds = array<i64: 1>}, {transform_indices = @transform_1, window_bounds = array<i64: 8, 16>}, {pipeline_mode = #tpu.pipeline_mode<synchronous>, transform_indices = @transform_2, window_bounds = array<i64: 16, 32>}, {pipeline_mode = #tpu.pipeline_mode<synchronous>, transform_indices = @transform_3, window_bounds = array<i64: 1, 32>}, {pipeline_mode = #tpu.pipeline_mode<synchronous>, transform_indices = @transform_4, window_bounds = array<i64: 1, 32>}, {pipeline_mode = #tpu.pipeline_mode<synchronous>, transform_indices = @transform_5, window_bounds = array<i64: 1, 32>}, {pipeline_mode = #tpu.pipeline_mode<synchronous>, transform_indices = @transform_6, window_bounds = array<i64: 32, 16>}, {pipeline_mode = #tpu.pipeline_mode<synchronous>, transform_indices = @transform_7, window_bounds = array<i64: 1, 16>}, {transform_indices = @transform_8, window_bounds = array<i64: 8, 16>}]} {
    %c0 = arith.constant 0 : index
    %c0_0 = arith.constant 0 : index
    %0 = vector.load %arg3[%c0, %c0_0] : memref<8x16xbf16, #tpu.memory_space<vmem>>, vector<8x16xbf16>
    %c0_1 = arith.constant 0 : index
    %c0_2 = arith.constant 0 : index
    %1 = vector.load %arg4[%c0_1, %c0_2] : memref<16x32xbf16, #tpu.memory_space<vmem>>, vector<16x32xbf16>
    %cst = arith.constant dense<0.000000e+00> : vector<8x32xf32>
    %2 = tpu.matmul %0, %1, %cst {dimension_numbers = #tpu.dot_dimension_numbers<[1], [0], [0], [1], [0, 0, 1, 1], [], []>} : vector<8x16xbf16>, vector<16x32xbf16>, vector<8x32xf32> -> vector<8x32xf32>
    %c0_3 = arith.constant 0 : index
    %c0_4 = arith.constant 0 : index
    %3 = vector.load %arg5[%c0_3, %c0_4] : memref<1x32xf32, #tpu.memory_space<vmem>>, vector<1x32xf32>
    %4 = vector.broadcast %3 : vector<1x32xf32> to vector<8x32xf32>
    %5 = arith.addf %2, %4 : vector<8x32xf32>
    %cst_5 = arith.constant 0.000000e+00 : f32
    %6 = vector.broadcast %cst_5 : f32 to vector<8x32xf32>
    %7 = arith.cmpf oge, %5, %6 : vector<8x32xf32>
    %cst_6 = arith.constant 0.00999999977 : f32
    %8 = vector.broadcast %cst_6 : f32 to vector<8x32xf32>
    %9 = arith.mulf %8, %5 : vector<8x32xf32>
    %10 = arith.select %7, %5, %9 : vector<8x32xi1>, vector<8x32xf32>
    %cst_7 = arith.constant dense<0.000000e+00> : vector<8xf32>
    %11 = vector.multi_reduction <add>, %10, %cst_7 [1] : vector<8x32xf32> to vector<8xf32>
    %12 = vector.shape_cast %11 : vector<8xf32> to vector<8x1xf32>
    %cst_8 = arith.constant 3.200000e+01 : f32
    %13 = vector.broadcast %cst_8 : f32 to vector<8x1xf32>
    %14 = arith.divf %12, %13 : vector<8x1xf32>
    %15 = vector.broadcast %14 : vector<8x1xf32> to vector<8x32xf32>
    %16 = arith.subf %10, %15 : vector<8x32xf32>
    %17 = arith.mulf %16, %16 : vector<8x32xf32>
    %cst_9 = arith.constant dense<0.000000e+00> : vector<8xf32>
    %18 = vector.multi_reduction <add>, %17, %cst_9 [1] : vector<8x32xf32> to vector<8xf32>
    %19 = vector.shape_cast %18 : vector<8xf32> to vector<8x1xf32>
    %cst_10 = arith.constant 3.200000e+01 : f32
    %20 = vector.broadcast %cst_10 : f32 to vector<8x1xf32>
    %21 = arith.divf %19, %20 : vector<8x1xf32>
    %22 = vector.broadcast %14 : vector<8x1xf32> to vector<8x32xf32>
    %23 = arith.subf %10, %22 : vector<8x32xf32>
    %cst_11 = arith.constant 9.99999974E-6 : f32
    %24 = vector.broadcast %cst_11 : f32 to vector<8x1xf32>
    %25 = arith.addf %21, %24 : vector<8x1xf32>
    %26 = math.rsqrt %25 : vector<8x1xf32>
    %27 = vector.broadcast %26 : vector<8x1xf32> to vector<8x32xf32>
    %28 = arith.mulf %23, %27 : vector<8x32xf32>
    %c0_12 = arith.constant 0 : index
    %c0_13 = arith.constant 0 : index
    %29 = vector.load %arg6[%c0_12, %c0_13] : memref<1x32xf32, #tpu.memory_space<vmem>>, vector<1x32xf32>
    %30 = vector.broadcast %29 : vector<1x32xf32> to vector<8x32xf32>
    %31 = arith.mulf %28, %30 : vector<8x32xf32>
    %c0_14 = arith.constant 0 : index
    %c0_15 = arith.constant 0 : index
    %32 = vector.load %arg7[%c0_14, %c0_15] : memref<1x32xf32, #tpu.memory_space<vmem>>, vector<1x32xf32>
    %33 = vector.broadcast %32 : vector<1x32xf32> to vector<8x32xf32>
    %34 = arith.addf %31, %33 : vector<8x32xf32>
    %35 = arith.truncf %34 : vector<8x32xf32> to vector<8x32xbf16>
    %c0_16 = arith.constant 0 : index
    %c0_17 = arith.constant 0 : index
    %36 = vector.load %arg8[%c0_16, %c0_17] : memref<32x16xbf16, #tpu.memory_space<vmem>>, vector<32x16xbf16>
    %cst_18 = arith.constant dense<0.000000e+00> : vector<8x16xf32>
    %37 = tpu.matmul %35, %36, %cst_18 {dimension_numbers = #tpu.dot_dimension_numbers<[1], [0], [0], [1], [0, 0, 1, 1], [], []>} : vector<8x32xbf16>, vector<32x16xbf16>, vector<8x16xf32> -> vector<8x16xf32>
    %c0_19 = arith.constant 0 : index
    %c0_20 = arith.constant 0 : index
    %38 = vector.load %arg9[%c0_19, %c0_20] : memref<1x16xf32, #tpu.memory_space<vmem>>, vector<1x16xf32>
    %39 = vector.broadcast %38 : vector<1x16xf32> to vector<8x16xf32>
    %40 = arith.addf %37, %39 : vector<8x16xf32>
    %c0_21 = arith.constant 0 : index
    %41 = memref.load %arg2[%c0_21] : memref<1xf32, #tpu.memory_space<smem>>
    %cst_22 = arith.constant 1.000000e+00 : f32
    %42 = arith.divf %cst_22, %41 : f32
    %43 = vector.broadcast %42 : f32 to vector<8x16xf32>
    %44 = arith.mulf %40, %43 : vector<8x16xf32>
    %45 = arith.negf %44 : vector<8x16xf32>
    %46 = math.exp %45 : vector<8x16xf32>
    %cst_23 = arith.constant 1.000000e+00 : f32
    %47 = vector.broadcast %cst_23 : f32 to vector<8x16xf32>
    %48 = arith.addf %47, %46 : vector<8x16xf32>
    %49 = arith.divf %47, %48 : vector<8x16xf32>
    %50 = tpu.iota {dimensions = array<i32: 0>} : vector<8x16xi32>
    %51 = tpu.iota {dimensions = array<i32: 1>} : vector<8x16xi32>
    %c8_i32 = arith.constant 8 : i32
    %52 = arith.muli %arg0, %c8_i32 : i32
    %53 = vector.broadcast %52 : i32 to vector<8x16xi32>
    %54 = arith.addi %53, %50 : vector<8x16xi32>
    %c0_24 = arith.constant 0 : index
    %55 = memref.load %arg1[%c0_24] : memref<1xi32, #tpu.memory_space<smem>>
    %c1013904242_i32 = arith.constant 1013904242 : i32
    %56 = arith.xori %55, %c1013904242_i32 : i32
    %c466688986_i32 = arith.constant 466688986 : i32
    %57 = arith.xori %56, %c466688986_i32 : i32
    %58 = vector.broadcast %55 : i32 to vector<8x16xi32>
    %59 = arith.addi %54, %58 : vector<8x16xi32>
    %c1013904242_i32_25 = arith.constant 1013904242 : i32
    %60 = vector.broadcast %c1013904242_i32_25 : i32 to vector<8x16xi32>
    %61 = arith.addi %51, %60 : vector<8x16xi32>
    %62 = arith.addi %59, %61 : vector<8x16xi32>
    %c13_i32 = arith.constant 13 : i32
    %63 = vector.broadcast %c13_i32 : i32 to vector<8x16xi32>
    %64 = arith.shli %61, %63 : vector<8x16xi32>
    %c32_i32 = arith.constant 32 : i32
    %c13_i32_26 = arith.constant 13 : i32
    %65 = arith.subi %c32_i32, %c13_i32_26 : i32
    %66 = vector.broadcast %65 : i32 to vector<8x16xi32>
    %67 = arith.shrui %61, %66 : vector<8x16xi32>
    %68 = arith.ori %64, %67 : vector<8x16xi32>
    %69 = arith.xori %68, %62 : vector<8x16xi32>
    %70 = arith.addi %62, %69 : vector<8x16xi32>
    %c15_i32 = arith.constant 15 : i32
    %71 = vector.broadcast %c15_i32 : i32 to vector<8x16xi32>
    %72 = arith.shli %69, %71 : vector<8x16xi32>
    %c32_i32_27 = arith.constant 32 : i32
    %c15_i32_28 = arith.constant 15 : i32
    %73 = arith.subi %c32_i32_27, %c15_i32_28 : i32
    %74 = vector.broadcast %73 : i32 to vector<8x16xi32>
    %75 = arith.shrui %69, %74 : vector<8x16xi32>
    %76 = arith.ori %72, %75 : vector<8x16xi32>
    %77 = arith.xori %76, %70 : vector<8x16xi32>
    %78 = arith.addi %70, %77 : vector<8x16xi32>
    %c26_i32 = arith.constant 26 : i32
    %79 = vector.broadcast %c26_i32 : i32 to vector<8x16xi32>
    %80 = arith.shli %77, %79 : vector<8x16xi32>
    %c32_i32_29 = arith.constant 32 : i32
    %c26_i32_30 = arith.constant 26 : i32
    %81 = arith.subi %c32_i32_29, %c26_i32_30 : i32
    %82 = vector.broadcast %81 : i32 to vector<8x16xi32>
    %83 = arith.shrui %77, %82 : vector<8x16xi32>
    %84 = arith.ori %80, %83 : vector<8x16xi32>
    %85 = arith.xori %84, %78 : vector<8x16xi32>
    %86 = arith.addi %78, %85 : vector<8x16xi32>
    %c6_i32 = arith.constant 6 : i32
    %87 = vector.broadcast %c6_i32 : i32 to vector<8x16xi32>
    %88 = arith.shli %85, %87 : vector<8x16xi32>
    %c32_i32_31 = arith.constant 32 : i32
    %c6_i32_32 = arith.constant 6 : i32
    %89 = arith.subi %c32_i32_31, %c6_i32_32 : i32
    %90 = vector.broadcast %89 : i32 to vector<8x16xi32>
    %91 = arith.shrui %85, %90 : vector<8x16xi32>
    %92 = arith.ori %88, %91 : vector<8x16xi32>
    %93 = arith.xori %92, %86 : vector<8x16xi32>
    %c1013904242_i32_33 = arith.constant 1013904242 : i32
    %94 = vector.broadcast %c1013904242_i32_33 : i32 to vector<8x16xi32>
    %95 = arith.addi %86, %94 : vector<8x16xi32>
    %96 = vector.broadcast %57 : i32 to vector<8x16xi32>
    %97 = arith.addi %93, %96 : vector<8x16xi32>
    %c1_i32 = arith.constant 1 : i32
    %98 = vector.broadcast %c1_i32 : i32 to vector<8x16xi32>
    %99 = arith.addi %97, %98 : vector<8x16xi32>
    %100 = arith.addi %95, %99 : vector<8x16xi32>
    %c17_i32 = arith.constant 17 : i32
    %101 = vector.broadcast %c17_i32 : i32 to vector<8x16xi32>
    %102 = arith.shli %99, %101 : vector<8x16xi32>
    %c32_i32_34 = arith.constant 32 : i32
    %c17_i32_35 = arith.constant 17 : i32
    %103 = arith.subi %c32_i32_34, %c17_i32_35 : i32
    %104 = vector.broadcast %103 : i32 to vector<8x16xi32>
    %105 = arith.shrui %99, %104 : vector<8x16xi32>
    %106 = arith.ori %102, %105 : vector<8x16xi32>
    %107 = arith.xori %106, %100 : vector<8x16xi32>
    %108 = arith.addi %100, %107 : vector<8x16xi32>
    %c29_i32 = arith.constant 29 : i32
    %109 = vector.broadcast %c29_i32 : i32 to vector<8x16xi32>
    %110 = arith.shli %107, %109 : vector<8x16xi32>
    %c32_i32_36 = arith.constant 32 : i32
    %c29_i32_37 = arith.constant 29 : i32
    %111 = arith.subi %c32_i32_36, %c29_i32_37 : i32
    %112 = vector.broadcast %111 : i32 to vector<8x16xi32>
    %113 = arith.shrui %107, %112 : vector<8x16xi32>
    %114 = arith.ori %110, %113 : vector<8x16xi32>
    %115 = arith.xori %114, %108 : vector<8x16xi32>
    %116 = arith.addi %108, %115 : vector<8x16xi32>
    %c16_i32 = arith.constant 16 : i32
    %117 = vector.broadcast %c16_i32 : i32 to vector<8x16xi32>
    %118 = arith.shli %115, %117 : vector<8x16xi32>
    %c32_i32_38 = arith.constant 32 : i32
    %c16_i32_39 = arith.constant 16 : i32
    %119 = arith.subi %c32_i32_38, %c16_i32_39 : i32
    %120 = vector.broadcast %119 : i32 to vector<8x16xi32>
    %121 = arith.shrui %115, %120 : vector<8x16xi32>
    %122 = arith.ori %118, %121 : vector<8x16xi32>
    %123 = arith.xori %122, %116 : vector<8x16xi32>
    %124 = arith.addi %116, %123 : vector<8x16xi32>
    %c24_i32 = arith.constant 24 : i32
    %125 = vector.broadcast %c24_i32 : i32 to vector<8x16xi32>
    %126 = arith.shli %123, %125 : vector<8x16xi32>
    %c32_i32_40 = arith.constant 32 : i32
    %c24_i32_41 = arith.constant 24 : i32
    %127 = arith.subi %c32_i32_40, %c24_i32_41 : i32
    %128 = vector.broadcast %127 : i32 to vector<8x16xi32>
    %129 = arith.shrui %123, %128 : vector<8x16xi32>
    %130 = arith.ori %126, %129 : vector<8x16xi32>
    %131 = arith.xori %130, %124 : vector<8x16xi32>
    %132 = vector.broadcast %57 : i32 to vector<8x16xi32>
    %133 = arith.addi %124, %132 : vector<8x16xi32>
    %134 = vector.broadcast %55 : i32 to vector<8x16xi32>
    %135 = arith.addi %131, %134 : vector<8x16xi32>
    %c2_i32 = arith.constant 2 : i32
    %136 = vector.broadcast %c2_i32 : i32 to vector<8x16xi32>
    %137 = arith.addi %135, %136 : vector<8x16xi32>
    %138 = arith.addi %133, %137 : vector<8x16xi32>
    %c13_i32_42 = arith.constant 13 : i32
    %139 = vector.broadcast %c13_i32_42 : i32 to vector<8x16xi32>
    %140 = arith.shli %137, %139 : vector<8x16xi32>
    %c32_i32_43 = arith.constant 32 : i32
    %c13_i32_44 = arith.constant 13 : i32
    %141 = arith.subi %c32_i32_43, %c13_i32_44 : i32
    %142 = vector.broadcast %141 : i32 to vector<8x16xi32>
    %143 = arith.shrui %137, %142 : vector<8x16xi32>
    %144 = arith.ori %140, %143 : vector<8x16xi32>
    %145 = arith.xori %144, %138 : vector<8x16xi32>
    %146 = arith.addi %138, %145 : vector<8x16xi32>
    %c15_i32_45 = arith.constant 15 : i32
    %147 = vector.broadcast %c15_i32_45 : i32 to vector<8x16xi32>
    %148 = arith.shli %145, %147 : vector<8x16xi32>
    %c32_i32_46 = arith.constant 32 : i32
    %c15_i32_47 = arith.constant 15 : i32
    %149 = arith.subi %c32_i32_46, %c15_i32_47 : i32
    %150 = vector.broadcast %149 : i32 to vector<8x16xi32>
    %151 = arith.shrui %145, %150 : vector<8x16xi32>
    %152 = arith.ori %148, %151 : vector<8x16xi32>
    %153 = arith.xori %152, %146 : vector<8x16xi32>
    %154 = arith.addi %146, %153 : vector<8x16xi32>
    %c26_i32_48 = arith.constant 26 : i32
    %155 = vector.broadcast %c26_i32_48 : i32 to vector<8x16xi32>
    %156 = arith.shli %153, %155 : vector<8x16xi32>
    %c32_i32_49 = arith.constant 32 : i32
    %c26_i32_50 = arith.constant 26 : i32
    %157 = arith.subi %c32_i32_49, %c26_i32_50 : i32
    %158 = vector.broadcast %157 : i32 to vector<8x16xi32>
    %159 = arith.shrui %153, %158 : vector<8x16xi32>
    %160 = arith.ori %156, %159 : vector<8x16xi32>
    %161 = arith.xori %160, %154 : vector<8x16xi32>
    %162 = arith.addi %154, %161 : vector<8x16xi32>
    %c6_i32_51 = arith.constant 6 : i32
    %163 = vector.broadcast %c6_i32_51 : i32 to vector<8x16xi32>
    %164 = arith.shli %161, %163 : vector<8x16xi32>
    %c32_i32_52 = arith.constant 32 : i32
    %c6_i32_53 = arith.constant 6 : i32
    %165 = arith.subi %c32_i32_52, %c6_i32_53 : i32
    %166 = vector.broadcast %165 : i32 to vector<8x16xi32>
    %167 = arith.shrui %161, %166 : vector<8x16xi32>
    %168 = arith.ori %164, %167 : vector<8x16xi32>
    %169 = arith.xori %168, %162 : vector<8x16xi32>
    %170 = vector.broadcast %55 : i32 to vector<8x16xi32>
    %171 = arith.addi %162, %170 : vector<8x16xi32>
    %c1013904242_i32_54 = arith.constant 1013904242 : i32
    %172 = vector.broadcast %c1013904242_i32_54 : i32 to vector<8x16xi32>
    %173 = arith.addi %169, %172 : vector<8x16xi32>
    %c3_i32 = arith.constant 3 : i32
    %174 = vector.broadcast %c3_i32 : i32 to vector<8x16xi32>
    %175 = arith.addi %173, %174 : vector<8x16xi32>
    %176 = arith.addi %171, %175 : vector<8x16xi32>
    %c8_i32_55 = arith.constant 8 : i32
    %177 = vector.broadcast %c8_i32_55 : i32 to vector<8x16xi32>
    %178 = arith.shrui %176, %177 : vector<8x16xi32>
    %179 = arith.uitofp %178 : vector<8x16xi32> to vector<8x16xf32>
    %cst_56 = arith.constant 5.96046448E-8 : f32
    %180 = vector.broadcast %cst_56 : f32 to vector<8x16xf32>
    %181 = arith.mulf %179, %180 : vector<8x16xf32>
    %182 = arith.cmpf olt, %181, %49 : vector<8x16xf32>
    %183 = arith.extui %182 : vector<8x16xi1> to vector<8x16xi32>
    %184 = arith.sitofp %183 : vector<8x16xi32> to vector<8x16xf32>
    %c0_57 = arith.constant 0 : index
    %c0_58 = arith.constant 0 : index
    %185 = vector.load %arg10[%c0_57, %c0_58] : memref<8x16xf32, #tpu.memory_space<vmem>>, vector<8x16xf32>
    tpu.vector_store %arg10[%c0_57, %c0_58], %184 {strides = array<i32>} : memref<8x16xf32, #tpu.memory_space<vmem>>, vector<8x16xf32>,
    return
  }
  func.func @transform_0(%arg0: i32, %arg1: memref<1xi32, #tpu.memory_space<smem>>) -> i32 {
    %c0_i32 = arith.constant 0 : i32
    %c0_i32_0 = arith.constant 0 : i32
    return %c0_i32 : i32
  }
  func.func @transform_1(%arg0: i32, %arg1: memref<1xi32, #tpu.memory_space<smem>>) -> (i32, i32) {
    %c0_i32 = arith.constant 0 : i32
    %c0_i32_0 = arith.constant 0 : i32
    return %arg0, %c0_i32 : i32, i32
  }
  func.func @transform_2(%arg0: i32, %arg1: memref<1xi32, #tpu.memory_space<smem>>) -> (i32, i32) {
    %c0_i32 = arith.constant 0 : i32
    %c0_i32_0 = arith.constant 0 : i32
    %c0_i32_1 = arith.constant 0 : i32
    return %c0_i32, %c0_i32_0 : i32, i32
  }
  func.func @transform_3(%arg0: i32, %arg1: memref<1xi32, #tpu.memory_space<smem>>) -> (i32, i32) {
    %c0_i32 = arith.constant 0 : i32
    %c0_i32_0 = arith.constant 0 : i32
    %c0_i32_1 = arith.constant 0 : i32
    return %c0_i32, %c0_i32_0 : i32, i32
  }
  func.func @transform_4(%arg0: i32, %arg1: memref<1xi32, #tpu.memory_space<smem>>) -> (i32, i32) {
    %c0_i32 = arith.constant 0 : i32
    %c0_i32_0 = arith.constant 0 : i32
    %c0_i32_1 = arith.constant 0 : i32
    return %c0_i32, %c0_i32_0 : i32, i32
  }
  func.func @transform_5(%arg0: i32, %arg1: memref<1xi32, #tpu.memory_space<smem>>) -> (i32, i32) {
    %c0_i32 = arith.constant 0 : i32
    %c0_i32_0 = arith.constant 0 : i32
    %c0_i32_1 = arith.constant 0 : i32
    return %c0_i32, %c0_i32_0 : i32, i32
  }
  func.func @transform_6(%arg0: i32, %arg1: memref<1xi32, #tpu.memory_space<smem>>) -> (i32, i32) {
    %c0_i32 = arith.constant 0 : i32
    %c0_i32_0 = arith.constant 0 : i32
    %c0_i32_1 = arith.constant 0 : i32
    return %c0_i32, %c0_i32_0 : i32, i32
  }
  func.func @transform_7(%arg0: i32, %arg1: memref<1xi32, #tpu.memory_space<smem>>) -> (i32, i32) {
    %c0_i32 = arith.constant 0 : i32
    %c0_i32_0 = arith.constant 0 : i32
    %c0_i32_1 = arith.constant 0 : i32
    return %c0_i32, %c0_i32_0 : i32, i32
  }
  func.func @transform_8(%arg0: i32, %arg1: memref<1xi32, #tpu.memory_space<smem>>) -> (i32, i32) {
    %c0_i32 = arith.constant 0 : i32
    %c0_i32_0 = arith.constant 0 : i32
    return %arg0, %c0_i32 : i32, i32
  }
}

</mosaic_0001>

<bundles_post_ra>
// kernel: tpu_custom_call.1
= control target key start
LH: loop header
LB: loop body
LE: loop exit
PB: predicated region body
PF: predicated region fallthrough
CT: control target
= control target key end

     0   :  { %vm47_vm0 = vcmask 130048   ;;  %s457_s0 = inlined_call_operand.<no memory space> [shape: s32[1], index: 0, kind: input, shape index: {}]   ;;  %s458_s1 = inlined_call_operand.<no memory space> [shape: f32[1], index: 1, kind: input, shape index: {}]   ;;  %s459_s2 = inlined_call_operand.vmem [shape: bf16[8,16], index: 2, kind: input, shape index: {}]   ;;  %s460_s3 = inlined_call_operand.vmem [shape: bf16[16,32], index: 3, kind: input, shape index: {}]   ;;  %s461_s4 = inlined_call_operand.vmem [shape: f32[1,32], index: 4, kind: input, shape index: {}]   ;;  %s462_s5 = inlined_call_operand.vmem [shape: f32[1,32], index: 5, kind: input, shape index: {}]   ;;  %s463_s6 = inlined_call_operand.vmem [shape: f32[1,32], index: 6, kind: input, shape index: {}]   ;;  %s464_s7 = inlined_call_operand.vmem [shape: bf16[32,16], index: 7, kind: input, shape index: {}]   ;;  %s465_s8 = inlined_call_operand.vmem [shape: f32[1,16], index: 8, kind: input, shape index: {}]   ;;  %s466_s9 = inlined_call_operand.hbm [shape: f32[8,16], index: 9, kind: output, shape index: {}]  }
   0x1   :  { %v310_v0 = vld [vmem:[%s460_s3] sm:$0xff] }
   0x2   :  { %v34_v1 = vld [vmem:[%s459_s2] sm:$0xf]  ;;  %58 = vmatpush.bf16.msra.mxu0 %v310_v0 }
   0x3   :  { %16 = vsyncpa [#allocation6], 0  ;;  %v318_v2 = vld [vmem:[%s461_s4] ss:$0 sm:$0xff]  ;;  %vm67_vm2 = vcmask 261120   ;;  %v358_v9 = vmov 32.0   ;;  %v145_v23 = vstv %s458_s1  ;;  %v182_v50 = vlaneseq }
   0x4   :  { %322 = vrcp.f32 %v358_v9  ;;  %v312_v21 = vld [vmem:[%s464_s7 + $0x8] sm:$0xff]  ;;  %v311_v22 = vld [vmem:[%s464_s7] sm:$0xff]  ;;  %v157_v29 = vand.u32 2147483648, %v145_v23  ;;  %vm151_vm4 = vweird.f32 %v145_v23  ;;  %v155_v31 = vand.u32 2147483647, %v145_v23  ;;  %s285_s29 = sshll.u32 %s466_s9, 4  ;;  %s286_s29 = int_to_ptr.hbm [resolvable:$true] %s285_s29 }
   0x5   :  { %298 = vmatmul.msk.bf16.vlgmr.msra.gmra.mxu0 %vm47_vm0, %v34_v1  ;;  %137 = vmatpush.bf16.msra.mxu1 %v312_v21  ;;  %324 = vrcp.f32 %v145_v23  ;;  %v319_v43 = vld [vmem:[%s462_s5] ss:$0 sm:$0xff]  ;;  %v185_v51 = vand.u32 127, %v182_v50  ;;  %v183_v52 = vshrl.u32 %v182_v50, 7  ;;  %v442_v54 = vstv %s457_s0  ;;  %s190_s22 = sxor.u32 1013904242, %s457_s0 }
   0x6   :  { %v158_v35 = vor.u32 1.1754944e-38, %v157_v29  ;;  %vm156_vm7 = vcmp.eq.f32.partialorder %v155_v31, 8.507059e+37  ;;  %v320_v46 = vld [vmem:[%s463_s6] ss:$0 sm:$0xff]  ;;  %s191_s23 = sxor.u32 466688986, %s190_s22 }
   0x7   :  { %v194_v53 = vadd.s32 1013904242, %v185_v51  ;;  %v193_v55 = vadd.s32 %v442_v54, %v183_v52 }
   0x9   :  { %138 = vmatpush.bf16.msra.mxu1 %v311_v22  ;;  %v196_v56 = vshll.u32 %v194_v53, 13  ;;  %v197_v57 = vshrl.u32 %v194_v53, 19  ;;  %v195_v58 = vadd.s32 %v194_v53, %v193_v55 }
   0xa   :  { %v323_v10 = vpop.eup %322 }
   0xb   :  { %v72_v11 = vmul.f32 32.0, %v323_v10  ;;  %vm76_vm3 = vweird.f32 %v323_v10  ;;  %v325_v27 = vpop.eup %324  ;;  %v198_v59 = vor.u32 %v197_v57, %v196_v56 }
   0xc   :  { %v147_v28 = vmul.f32 %v325_v27, %v145_v23  ;;  %vm152_vm5 = vweird.f32 %v325_v27 }
   0xd   :  { %v73_v12 = vsub.f32 1.0, %v72_v11  ;;  %vm153_vm6 = vmor %vm151_vm4, %vm152_vm5  ;;  %v199_v60 = vxor.u32 %v198_v59, %v195_v58 }
   0xe   :  { %v148_v30 = vsub.f32 1.0, %v147_v28 }
   0xf   :  { %v74_v13 = vmul.f32 %v323_v10, %v73_v12  ;;  %v201_v61 = vshll.u32 %v199_v60, 15  ;;  %v202_v62 = vshrl.u32 %v199_v60, 17  ;;  %v200_v63 = vadd.s32 %v199_v60, %v195_v58  ;;  %v321_v60 = vld [vmem:[%s465_s8] ss:$0 sm:$0xff]  ;;  %s359_s8 = smov [#allocation5]  }
  0x10   :  { %v149_v33 = vmul.f32 %v325_v27, %v148_v30  ;;  %v216_v12 = vstv %s191_s23  ;;  %s283_s26 = sshll.u32 %s359_s8, 4  ;;  %s284_s26 = int_to_ptr.vmem [resolvable:$true] %s283_s26 }
  0x11   :  { %v75_v14 = vadd.f32 %v323_v10, %v74_v13  ;;  %v203_v0 = vor.u32 %v202_v62, %v201_v61 }
  0x12   :  { %v150_v36 = vadd.f32 %v325_v27, %v149_v33 }
  0x13   :  { %v77_v15 = vsel %vm76_vm3, %v323_v10, %v75_v14  ;;  %v204_v1 = vxor.u32 %v203_v0, %v200_v63 }
  0x14   :  { %v154_v38 = vsel %vm153_vm6, %v325_v27, %v150_v36 }
  0x15   :  { %v159_v40 = vsel %vm156_vm7, %v158_v35, %v154_v38 }
  0x16   :  { %313 = vpush %v159_v40 }
  0x47   :  { %s314_s25 = spop %313 }
  0x82   :  { %v60_v3 = vpop.f32.mrf.mxu0 }
  0x83   :  { %v61_v4 = vadd.f32 %v318_v2, %v60_v3  ;;  %v206_v2 = vshll.u32 %v204_v1, 26  ;;  %v207_v3 = vshrl.u32 %v204_v1, 6 }
  0x85   :  { %v65_v5 = vmul.f32 0.01, %v61_v4  ;;  %vm64_vm1 = vcmp.ge.f32.partialorder %v61_v4, 0.0 }
  0x87   :  { %v66_v6 = vsel %vm64_vm1, %v61_v4, %v65_v5  ;;  %v205_v4 = vadd.s32 %v204_v1, %v200_v63  ;;  %v208_v5 = vor.u32 %v207_v3, %v206_v2  ;;  %v161_v63 = vstv %s314_s25 }
  0x88   :  { %v68_v7 = vsel %vm67_vm2, %v66_v6, 0.0 }
  0x89   :  { %69 = vadd.xlane.f32.xlu0 %v68_v7 }
  0x8a   :  { %v62_v8 = vpop.f32.mrf.mxu0 }
  0xfc   :  { %v70_v16 = vpop.xlane.xlu0 %69 }
  0xfd   :  { %v78_v17 = vmul.f32 %v77_v15, %v70_v16 }
  0xff   :  { %v79_v18 = vsub.f32 %v66_v6, %v78_v17  ;;  %v209_v6 = vxor.u32 %v208_v5, %v205_v4 }
 0x101   :  { %v80_v19 = vmul.f32 %v79_v18, %v79_v18  ;;  %v211_v7 = vshll.u32 %v209_v6, 6  ;;  %v212_v8 = vshrl.u32 %v209_v6, 26  ;;  %v210_v9 = vadd.s32 %v209_v6, %v205_v4 }
 0x103   :  { %v81_v20 = vsel %vm67_vm2, %v80_v19, 0.0  ;;  %v213_v10 = vor.u32 %v212_v8, %v211_v7 }
 0x104   :  { %82 = vadd.xlane.f32.xlu0 %v81_v20 }
 0x105   :  { %v214_v11 = vxor.u32 %v213_v10, %v210_v9 }
 0x107   :  { %v217_v13 = vadd.s32 %v216_v12, %v214_v11 }
 0x109   :  { %v218_v14 = vadd.s32 1, %v217_v13 }
 0x10b   :  { %v220_v16 = vshll.u32 %v218_v14, 17  ;;  %v221_v17 = vshrl.u32 %v218_v14, 15 }
 0x10d   :  { %v222_v19 = vor.u32 %v221_v17, %v220_v16 }
 0x177   :  { %v83_v24 = vpop.xlane.xlu0 %82 }
 0x178   :  { %v84_v25 = vmul.f32 %v83_v24, %v77_v15  ;;  %v215_v15 = vadd.s32 1013904242, %v210_v9 }
 0x17a   :  { %v85_v26 = vadd.f32 1e-05, %v84_v25 }
 0x17c   :  { %326 = vrsqrt.f32 %v85_v26  ;;  %vm92_vm9 = vweird.f32 %v85_v26 }
 0x182   :  { %v327_v32 = vpop.eup %326 }
 0x183   :  { %v87_v34 = vmul.f32 %v327_v32, %v85_v26  ;;  %vm93_vm8 = vweird.f32 %v327_v32 }
 0x184   :  { %vm94_vm10 = vmor %vm92_vm9, %vm93_vm8 }
 0x185   :  { %v88_v37 = vmul.f32 %v327_v32, %v87_v34 }
 0x187   :  { %v89_v39 = vmul.f32 0.5, %v88_v37 }
 0x189   :  { %v90_v41 = vsub.f32 1.5, %v89_v39 }
 0x18b   :  { %v91_v42 = vmul.f32 %v327_v32, %v90_v41 }
 0x18d   :  { %v95_v44 = vsel %vm94_vm10, %v327_v32, %v91_v42 }
 0x18e   :  { %v96_v45 = vmul.f32 %v95_v44, %v79_v18  ;;  %v219_v18 = vadd.s32 %v218_v14, %v215_v15 }
 0x190   :  { %v101_v47 = vmul.f32 %v319_v43, %v96_v45  ;;  %v223_v20 = vxor.u32 %v222_v19, %v219_v18 }
 0x192   :  { %v106_v48 = vadd.f32 %v320_v46, %v101_v47  ;;  %v225_v21 = vshll.u32 %v223_v20, 29  ;;  %v226_v22 = vshrl.u32 %v223_v20, 3  ;;  %v224_v23 = vadd.s32 %v223_v20, %v219_v18 }
 0x194   :  { %v107_v49 = vpack.c.bf16 %v106_v48, %v106_v48  ;;  %v227_v24 = vor.u32 %v226_v22, %v225_v21 }
 0x196   :  { %307 = vmatmul.msk.bf16.vlgmr.msra.gmra.mxu1 %vm67_vm2, %v107_v49  ;;  %v228_v25 = vxor.u32 %v227_v24, %v224_v23 }
 0x198   :  { %v230_v26 = vshll.u32 %v228_v25, 16  ;;  %v231_v27 = vshrl.u32 %v228_v25, 16  ;;  %v229_v28 = vadd.s32 %v228_v25, %v224_v23 }
 0x19a   :  { %v232_v29 = vor.u32 %v231_v27, %v230_v26  ;;  %v360_v26 = vmov 0.0  }
 0x19c   :  { %v233_v30 = vxor.u32 %v232_v29, %v229_v28 }
 0x19e   :  { %v235_v31 = vshll.u32 %v233_v30, 24  ;;  %v236_v32 = vshrl.u32 %v233_v30, 8  ;;  %v234_v33 = vadd.s32 %v233_v30, %v229_v28 }
 0x1a0   :  { %v237_v34 = vor.u32 %v236_v32, %v235_v31  ;;  %v239_v38 = vadd.s32 %v234_v33, %v216_v12 }
 0x1a2   :  { %v238_v35 = vxor.u32 %v237_v34, %v234_v33 }
 0x1a4   :  { %v240_v36 = vadd.s32 %v238_v35, %v442_v54 }
 0x1a6   :  { %v241_v37 = vadd.s32 2, %v240_v36 }
 0x1a8   :  { %v243_v39 = vshll.u32 %v241_v37, 13  ;;  %v244_v40 = vshrl.u32 %v241_v37, 19  ;;  %v242_v41 = vadd.s32 %v241_v37, %v239_v38 }
 0x1aa   :  { %v245_v42 = vor.u32 %v244_v40, %v243_v39 }
 0x1ac   :  { %v246_v43 = vxor.u32 %v245_v42, %v242_v41 }
 0x1ae   :  { %v248_v44 = vshll.u32 %v246_v43, 15  ;;  %v249_v45 = vshrl.u32 %v246_v43, 17  ;;  %v247_v46 = vadd.s32 %v246_v43, %v242_v41 }
 0x1b0   :  { %v250_v47 = vor.u32 %v249_v45, %v248_v44 }
 0x1b2   :  { %v251_v48 = vxor.u32 %v250_v47, %v247_v46 }
 0x1b4   :  { %v253_v49 = vshll.u32 %v251_v48, 26  ;;  %v254_v50 = vshrl.u32 %v251_v48, 6  ;;  %v252_v51 = vadd.s32 %v251_v48, %v247_v46 }
 0x1b6   :  { %v255_v52 = vor.u32 %v254_v50, %v253_v49 }
 0x1b8   :  { %v256_v53 = vxor.u32 %v255_v52, %v252_v51 }
 0x1ba   :  { %v258_v55 = vshll.u32 %v256_v53, 6  ;;  %v259_v56 = vshrl.u32 %v256_v53, 26  ;;  %v257_v57 = vadd.s32 %v256_v53, %v252_v51 }
 0x1bc   :  { %v260_v58 = vor.u32 %v259_v56, %v258_v55  ;;  %v262_v1 = vadd.s32 %v257_v57, %v442_v54 }
 0x1be   :  { %v261_v59 = vxor.u32 %v260_v58, %v257_v57 }
 0x1c0   :  { %v263_v61 = vadd.s32 1013904242, %v261_v59 }
 0x1c2   :  { %v264_v2 = vadd.s32 3, %v263_v61 }
 0x1c4   :  { %v265_v5 = vadd.s32 %v264_v2, %v262_v1 }
 0x1c6   :  { %v266_v7 = vshrl.u32 %v265_v5, 8 }
 0x1c8   :  { %v267_v9 = vshrl.u32 %v266_v7, 16  ;;  %v268_v11 = vand.u32 65535, %v266_v7 }
 0x1ca   :  { %v269_v12 = vcvt.s32.f32 %v267_v9  ;;  %v271_v14 = vcvt.s32.f32 %v268_v11 }
 0x1cc   :  { %v270_v13 = vmul.f32 65536.0, %v269_v12 }
 0x1ce   :  { %v272_v18 = vadd.f32 %v271_v14, %v270_v13 }
 0x1d0   :  { %v273_v22 = vmul.f32 5.9604645e-08, %v272_v18 }
 0x213   :  { %v140_v62 = vpop.f32.mrf.mxu1 }
 0x214   :  { %v141_v0 = vadd.f32 %v321_v60, %v140_v62 }
 0x216   :  { %v162_v3 = vmul.f32 %v161_v63, %v141_v0 }
 0x218   :  { %v308_v4 = vmul.f32 -1.442695, %v162_v3 }
 0x21a   :  { %328 = vpow2.f32 %v308_v4 }
 0x21b   :  { %v142_v6 = vpop.f32.mrf.mxu1 }
 0x220   :  { %v329_v8 = vpop.eup %328 }
 0x221   :  { %v166_v10 = vadd.f32 1.0, %v329_v8 }
 0x223   :  { %330 = vrcp.f32 %v166_v10  ;;  %v178_v54 = vand.u32 2147483648, %v166_v10  ;;  %v176_v20 = vand.u32 2147483647, %v166_v10  ;;  %vm172_vm12 = vweird.f32 %v166_v10 }
 0x225   :  { %v179_v23 = vor.u32 1.1754944e-38, %v178_v54  ;;  %vm177_vm14 = vcmp.eq.f32.partialorder %v176_v20, 8.507059e+37 }
 0x229   :  { %v331_v15 = vpop.eup %330 }
 0x22a   :  { %v168_v16 = vmul.f32 %v331_v15, %v166_v10  ;;  %vm173_vm11 = vweird.f32 %v331_v15 }
 0x22b   :  { %vm174_vm13 = vmor %vm172_vm12, %vm173_vm11 }
 0x22c   :  { %v169_v17 = vsub.f32 1.0, %v168_v16 }
 0x22e   :  { %v170_v19 = vmul.f32 %v331_v15, %v169_v17 }
 0x230   :  { %v171_v21 = vadd.f32 %v331_v15, %v170_v19 }
 0x232   :  { %v175_v24 = vsel %vm174_vm13, %v331_v15, %v171_v21 }
 0x233   :  { %v180_v25 = vsel %vm177_vm14, %v179_v23, %v175_v24 }
 0x234   :  { %vm274_vm15 = vcmp.lt.f32.partialorder %v273_v22, %v180_v25 }
 0x235   :  { %v309_v27 = vsel %vm274_vm15, 1.0, %v360_v26 }
 0x236   :  { %277 = vst.msk [vmem:[#allocation5] sm:$0xff] %vm47_vm0, %v309_v27 }
 0x237   :  { %288 = dma.vmem_to_hbm [thread:$0]  %s284_s26, 128, %s286_s29, [#allocation6]  }
 0x238   :  { %356 = dma.done.wait [#allocation6], 128  }
 0x239   :  { %357 = vsyncadd [#allocation6], 4294967168 }
 0x23a   :  { %293 = vsyncpa [#allocation6], 1 }

</bundles_post_ra>
